<compile_context>
chip_gen: v6e
topology: v6e:2x2x1
jax: 0.10.0
libtpu: 0.0.40
codegen_flags: <defaults>
</compile_context>

<pallas_src>
import jax
import jax.numpy as jnp
from jax.experimental import pallas as pl
from jax.experimental.pallas import tpu as pltpu


def _round_up(x, m):
    return (x + m - 1) // m * m


def _pick_tile_b(batch, src_len, enc2, attn_dim, vmem_budget_bytes=8 << 20):
    """Pick a batch tile that keeps the pipeline well under the scoped VMEM limit."""
    bytes_per_row = src_len * (
        2 * 2 * enc2            # double-buffered bf16 encoder block
        + 2 * 4 * attn_dim      # f32 enc_proj + energy intermediates
        + 6 * 4)                # scores / mask / exp / softmax temporaries
    tile = (vmem_budget_bytes // max(bytes_per_row, 1)) // 16 * 16
    tile = max(16, int(tile))
    return int(min(tile, _round_up(batch, 16)))


def padded_attention_kernel(dec_ref, enc_ref, len_ref,
                            wdec_ref, wenc_ref, b_ref, v_ref,
                            out_ref):
    """Fused additive attention for one batch tile.

    dec_ref  : (tile_b, dec_hid)        bf16 decoder hidden state
    enc_ref  : (src_len, tile_b, enc2)  bf16 encoder outputs (time-major)
    len_ref  : (tile_b, 1)              int32 valid lengths per batch row
    wdec_ref : (dec_hid, attn_dim)      bf16 attn_W columns acting on decoder part
    wenc_ref : (enc2, attn_dim)         bf16 attn_W columns acting on encoder part
    b_ref    : (1, attn_dim)            f32 attn_W bias
    v_ref    : (1, attn_dim)            f32 attn_v weight
    out_ref  : (src_len, tile_b, 1)     f32 softmax attention weights (time-major)
    """
    src_len, tile_b, enc2 = enc_ref.shape
    attn_dim = b_ref.shape[1]

    # Decoder projection, hoisted out of the src_len repetition: (tile_b, A) f32.
    dec_proj = jnp.dot(dec_ref[...], wdec_ref[...],
                       preferred_element_type=jnp.float32)

    # Encoder projection: one lane-dense bf16 MXU matmul over all (s, b) rows.
    # tile_b % 16 == 0 keeps these reshapes tile-aligned (no data movement).
    enc_flat = enc_ref[...].reshape(src_len * tile_b, enc2)
    enc_proj = jnp.dot(enc_flat, wenc_ref[...],
                       preferred_element_type=jnp.float32)
    enc_proj = enc_proj.reshape(src_len, tile_b, attn_dim)

    # energy = tanh(W @ cat(dec, enc) + b), concat split into the two matmuls.
    energy = jnp.tanh(enc_proj + dec_proj[None, :, :] + b_ref[...])

    # scores[s, b] = v . energy[s, b, :]  (lane reduction, keepdims keeps layout)
    scores = jnp.sum(energy * v_ref[...], axis=-1, keepdims=True)   # (S, tile_b, 1)

    # Padding mask rebuilt in-kernel from per-row lengths (no (B, S) HBM stream).
    pos = jax.lax.broadcasted_iota(jnp.int32, (src_len, tile_b, 1), 0)
    valid = pos < len_ref[...][None, :, :]
    scores = jnp.where(valid, scores, jnp.float32(-1e10))

    # Numerically-stable softmax over src_len (leading axis: pure elementwise
    # accumulation across the S sub-tiles, no cross-lane shuffles).
    m = jnp.max(scores, axis=0, keepdims=True)
    e = jnp.exp(scores - m)
    denom = jnp.sum(e, axis=0, keepdims=True)
    out_ref[...] = e / denom


def padded_attention_forward(decoder_hidden, encoder_outputs, mask, params,
                             *, tile_b=None):
    """Pallas-backed forward of PaddedAttention.

    decoder_hidden : (batch, dec_hid_dim) f32
    encoder_outputs: (src_len, batch, 2*enc_hid_dim) f32  (time-major, as in PyTorch)
    mask           : (batch, src_len) int/float, nonzero = valid (contiguous padding mask)
    returns        : (batch, src_len) f32 softmax attention weights
    """
    src_len, batch, enc2 = encoder_outputs.shape
    dec_hid = decoder_hidden.shape[1]

    attn_w = params["attn_W_weight"]            # (attn_dim, dec_hid + enc2)
    attn_b = params["attn_W_bias"]              # (attn_dim,)
    attn_v = params["attn_v_weight"]            # (1, attn_dim)
    attn_dim = attn_w.shape[0]

    if tile_b is None:
        tile_b = _pick_tile_b(batch, src_len, enc2, attn_dim)
    tile_b = max(16, (int(tile_b) // 16) * 16)   # bf16 sublane-packing alignment
    b_pad = _round_up(batch, tile_b)

    # Split the concat weight: cat order is (decoder_hidden, encoder_outputs).
    w_dec_t = attn_w[:, :dec_hid].T.astype(jnp.bfloat16)     # (dec_hid, attn_dim)
    w_enc_t = attn_w[:, dec_hid:].T.astype(jnp.bfloat16)     # (enc2, attn_dim)
    bias = attn_b[None, :].astype(jnp.float32)               # (1, attn_dim)
    v_row = attn_v.astype(jnp.float32)                       # (1, attn_dim)

    dec = decoder_hidden.astype(jnp.bfloat16)                # (B, dec_hid)
    enc = encoder_outputs.astype(jnp.bfloat16)               # (S, B, enc2) time-major
    # Per-row valid lengths instead of streaming the (B, S) mask.
    lengths = jnp.sum(mask != 0, axis=1).astype(jnp.int32)[:, None]   # (B, 1)

    if b_pad != batch:
        pad = b_pad - batch
        dec = jnp.pad(dec, ((0, pad), (0, 0)))
        enc = jnp.pad(enc, ((0, 0), (0, pad), (0, 0)))
        lengths = jnp.pad(lengths, ((0, pad), (0, 0)))       # length 0 -> fully masked

    grid = (b_pad // tile_b,)

    flops = (2 * b_pad * src_len * enc2 * attn_dim           # encoder projection
             + 2 * b_pad * dec_hid * attn_dim                # decoder projection
             + 2 * b_pad * src_len * attn_dim)               # v-dot
    transcendentals = b_pad * src_len * (attn_dim + 1)       # tanh + exp
    bytes_accessed = (2 * (enc.size + dec.size + w_dec_t.size + w_enc_t.size)
                      + 4 * (bias.size + v_row.size + lengths.size
                             + src_len * b_pad))

    out = pl.pallas_call(
        padded_attention_kernel,
        out_shape=jax.ShapeDtypeStruct((src_len, b_pad, 1), jnp.float32),
        grid=grid,
        in_specs=[
            pl.BlockSpec((tile_b, dec_hid), lambda i: (i, 0)),
            pl.BlockSpec((src_len, tile_b, enc2), lambda i: (0, i, 0)),
            pl.BlockSpec((tile_b, 1), lambda i: (i, 0)),
            pl.BlockSpec((dec_hid, attn_dim), lambda i: (0, 0)),
            pl.BlockSpec((enc2, attn_dim), lambda i: (0, 0)),
            pl.BlockSpec((1, attn_dim), lambda i: (0, 0)),
            pl.BlockSpec((1, attn_dim), lambda i: (0, 0)),
        ],
        out_specs=pl.BlockSpec((src_len, tile_b, 1), lambda i: (0, i, 0)),
        compiler_params=pltpu.CompilerParams(
            dimension_semantics=("parallel",),
            vmem_limit_bytes=32 * 1024 * 1024),
        cost_estimate=pl.CostEstimate(flops=flops,
                                      transcendentals=transcendentals,
                                      bytes_accessed=bytes_accessed),
    )(dec, enc, lengths, w_dec_t, w_enc_t, bias, v_row)

    # Tiny (S, B) -> (B, S) layout fixup in the wrapper (negligible vs. the
    # encoder slab, which we deliberately did NOT transpose).
    return jnp.transpose(out[:, :batch, 0])


def reference_forward(decoder_hidden, encoder_outputs, mask, params):
    """Pure-JAX reference mirroring the PyTorch module exactly (f32)."""
    attn_w = params["attn_W_weight"]
    attn_b = params["attn_W_bias"]
    attn_v = params["attn_v_weight"]
    src_len = encoder_outputs.shape[0]

    rep = jnp.repeat(decoder_hidden[:, None, :], src_len, axis=1)   # (B, S, dec_hid)
    enc = jnp.transpose(encoder_outputs, (1, 0, 2))                 # (B, S, enc2)
    cat = jnp.concatenate([rep, enc], axis=2)                       # (B, S, attn_in)
    energy = jnp.tanh(cat @ attn_w.T + attn_b)                      # (B, S, attn_dim)
    attention = (energy @ attn_v.T)[..., 0]                         # (B, S)
    attention = jnp.where(mask == 0, -1e10, attention)
    return jax.nn.softmax(attention, axis=1)


def init_params(key, enc_hid_dim, dec_hid_dim, attn_dim):
    """Deterministic init mirroring PyTorch nn.Linear shapes/scales."""
    attn_in = enc_hid_dim * 2 + dec_hid_dim
    k_w, k_b, k_v = jax.random.split(key, 3)
    bound_w = 1.0 / jnp.sqrt(attn_in)
    bound_v = 1.0 / jnp.sqrt(attn_dim)
    attn_W_weight = jax.random.uniform(k_w, (attn_dim, attn_in), jnp.float32,
                                       -bound_w, bound_w)
    attn_W_bias = jax.random.uniform(k_b, (attn_dim,), jnp.float32,
                                     -bound_w, bound_w)
    attn_v_weight = jax.random.uniform(k_v, (1, attn_dim), jnp.float32,
                                       -bound_v, bound_v)
    return {"attn_W_weight": attn_W_weight,
            "attn_W_bias": attn_W_bias,
            "attn_v_weight": attn_v_weight}


if __name__ == "__main__":
    # Module hyperparameters (small, TPU-friendly shapes).
    enc_hid_dim = 32          # bidirectional encoder -> encoder_outputs have 2*enc_hid
    dec_hid_dim = 32
    attn_dim = 64
    src_len = 10
    batch = 30                # not a multiple of the tile -> exercises padding path

    key = jax.random.PRNGKey(0)
    k_param, k_dec, k_enc, k_len = jax.random.split(key, 4)
    params = init_params(k_param, enc_hid_dim, dec_hid_dim, attn_dim)

    decoder_hidden = jax.random.normal(k_dec, (batch, dec_hid_dim), jnp.float32)
    encoder_outputs = jax.random.normal(k_enc, (src_len, batch, 2 * enc_hid_dim),
                                        jnp.float32)
    # Padding mask: 1 for valid positions, 0 for padding (each row has >= 1 valid).
    lengths = jax.random.randint(k_len, (batch,), 1, src_len + 1, dtype=jnp.int32)
    mask = (jnp.arange(src_len)[None, :] < lengths[:, None]).astype(jnp.int32)

    # tile_b=16 with batch=30 -> padded batch 32, grid=(2,): exercises the
    # pipelined, "parallel" batch-tiled path.
    attn = padded_attention_forward(decoder_hidden, encoder_outputs, mask, params,
                                    tile_b=16)
    jax.block_until_ready(attn)

    # Correctness check against the pure-JAX f32 reference (tolerances account
    # for bf16 MXU inputs with f32 accumulation).
    attn_ref = reference_forward(decoder_hidden, encoder_outputs, mask, params)
    assert attn.shape == (batch, src_len)
    assert jnp.allclose(attn, attn_ref, rtol=2e-2, atol=1e-2), \
        float(jnp.max(jnp.abs(attn - attn_ref)))
    # Softmax rows over valid positions must sum to 1.
    assert jnp.allclose(jnp.sum(attn, axis=1), jnp.ones((batch,)), atol=1e-4)

    print("KERNEL_OK")
</pallas_src>

<mosaic_0001>
module attributes {stable_mosaic.version = 11 : i64} {
  func.func @padded_attention_kernel(%arg0: i32, %arg1: memref<16x32xbf16, #tpu.memory_space<vmem>>, %arg2: memref<10x16x64xbf16, #tpu.memory_space<vmem>>, %arg3: memref<16x1xi32, #tpu.memory_space<vmem>>, %arg4: memref<32x64xbf16, #tpu.memory_space<vmem>>, %arg5: memref<64x64xbf16, #tpu.memory_space<vmem>>, %arg6: memref<1x64xf32, #tpu.memory_space<vmem>>, %arg7: memref<1x64xf32, #tpu.memory_space<vmem>>, %arg8: memref<10x16x1xf32, #tpu.memory_space<vmem>>) attributes {dimension_semantics = [#tpu.dimension_semantics<parallel>], iteration_bounds = array<i64: 2>, scalar_prefetch = 0 : i64, scratch_operands = 0 : i64, tpu.core_type = #tpu.core_type<tc>, window_params = [{transform_indices = @transform_0, window_bounds = array<i64: 16, 32>}, {transform_indices = @transform_1, window_bounds = array<i64: 10, 16, 64>}, {transform_indices = @transform_2, window_bounds = array<i64: 16, 1>}, {pipeline_mode = #tpu.pipeline_mode<synchronous>, transform_indices = @transform_3, window_bounds = array<i64: 32, 64>}, {pipeline_mode = #tpu.pipeline_mode<synchronous>, transform_indices = @transform_4, window_bounds = array<i64: 64, 64>}, {pipeline_mode = #tpu.pipeline_mode<synchronous>, transform_indices = @transform_5, window_bounds = array<i64: 1, 64>}, {pipeline_mode = #tpu.pipeline_mode<synchronous>, transform_indices = @transform_6, window_bounds = array<i64: 1, 64>}, {transform_indices = @transform_7, window_bounds = array<i64: 10, 16, 1>}]} {
    %c0 = arith.constant 0 : index
    %c0_0 = arith.constant 0 : index
    %0 = vector.load %arg1[%c0, %c0_0] : memref<16x32xbf16, #tpu.memory_space<vmem>>, vector<16x32xbf16>
    %c0_1 = arith.constant 0 : index
    %c0_2 = arith.constant 0 : index
    %1 = vector.load %arg4[%c0_1, %c0_2] : memref<32x64xbf16, #tpu.memory_space<vmem>>, vector<32x64xbf16>
    %cst = arith.constant dense<0.000000e+00> : vector<16x64xf32>
    %2 = tpu.matmul %0, %1, %cst {dimension_numbers = #tpu.dot_dimension_numbers<[1], [0], [0], [1], [0, 0, 1, 1], [], []>} : vector<16x32xbf16>, vector<32x64xbf16>, vector<16x64xf32> -> vector<16x64xf32>
    %c0_3 = arith.constant 0 : index
    %c0_4 = arith.constant 0 : index
    %c0_5 = arith.constant 0 : index
    %3 = vector.load %arg2[%c0_3, %c0_4, %c0_5] : memref<10x16x64xbf16, #tpu.memory_space<vmem>>, vector<10x16x64xbf16>
    %4 = vector.shape_cast %3 : vector<10x16x64xbf16> to vector<160x64xbf16>
    %c0_6 = arith.constant 0 : index
    %c0_7 = arith.constant 0 : index
    %5 = vector.load %arg5[%c0_6, %c0_7] : memref<64x64xbf16, #tpu.memory_space<vmem>>, vector<64x64xbf16>
    %cst_8 = arith.constant dense<0.000000e+00> : vector<160x64xf32>
    %6 = tpu.matmul %4, %5, %cst_8 {dimension_numbers = #tpu.dot_dimension_numbers<[1], [0], [0], [1], [0, 0, 1, 1], [], []>} : vector<160x64xbf16>, vector<64x64xbf16>, vector<160x64xf32> -> vector<160x64xf32>
    %7 = vector.shape_cast %6 : vector<160x64xf32> to vector<10x16x64xf32>
    %8 = vector.shape_cast %2 : vector<16x64xf32> to vector<1x16x64xf32>
    %9 = vector.broadcast %8 : vector<1x16x64xf32> to vector<10x16x64xf32>
    %10 = arith.addf %7, %9 : vector<10x16x64xf32>
    %c0_9 = arith.constant 0 : index
    %c0_10 = arith.constant 0 : index
    %11 = vector.load %arg6[%c0_9, %c0_10] : memref<1x64xf32, #tpu.memory_space<vmem>>, vector<1x64xf32>
    %12 = vector.shape_cast %11 : vector<1x64xf32> to vector<1x1x64xf32>
    %13 = vector.broadcast %12 : vector<1x1x64xf32> to vector<10x16x64xf32>
    %14 = arith.addf %10, %13 : vector<10x16x64xf32>
    %15 = math.tanh %14 : vector<10x16x64xf32>
    %c0_11 = arith.constant 0 : index
    %c0_12 = arith.constant 0 : index
    %16 = vector.load %arg7[%c0_11, %c0_12] : memref<1x64xf32, #tpu.memory_space<vmem>>, vector<1x64xf32>
    %17 = vector.shape_cast %16 : vector<1x64xf32> to vector<1x1x64xf32>
    %18 = vector.broadcast %17 : vector<1x1x64xf32> to vector<10x16x64xf32>
    %19 = arith.mulf %15, %18 : vector<10x16x64xf32>
    %cst_13 = arith.constant dense<0.000000e+00> : vector<10x16xf32>
    %20 = vector.multi_reduction <add>, %19, %cst_13 [2] : vector<10x16x64xf32> to vector<10x16xf32>
    %21 = vector.shape_cast %20 : vector<10x16xf32> to vector<10x16x1xf32>
    %22 = tpu.iota {dimensions = array<i32: 0>} : vector<10x16x1xi32>
    %c0_14 = arith.constant 0 : index
    %c0_15 = arith.constant 0 : index
    %23 = vector.load %arg3[%c0_14, %c0_15] : memref<16x1xi32, #tpu.memory_space<vmem>>, vector<16x1xi32>
    %24 = vector.shape_cast %23 : vector<16x1xi32> to vector<1x16x1xi32>
    %25 = vector.broadcast %24 : vector<1x16x1xi32> to vector<10x16x1xi32>
    %26 = arith.cmpi slt, %22, %25 : vector<10x16x1xi32>
    %cst_16 = arith.constant -1.000000e+10 : f32
    %27 = vector.broadcast %cst_16 : f32 to vector<10x16x1xf32>
    %28 = arith.select %26, %21, %27 : vector<10x16x1xi1>, vector<10x16x1xf32>
    %cst_17 = arith.constant dense<0xFF800000> : vector<16x1xf32>
    %29 = vector.multi_reduction <maximumf>, %28, %cst_17 [0] : vector<10x16x1xf32> to vector<16x1xf32>
    %30 = vector.shape_cast %29 : vector<16x1xf32> to vector<1x16x1xf32>
    %31 = vector.broadcast %30 : vector<1x16x1xf32> to vector<10x16x1xf32>
    %32 = arith.subf %28, %31 : vector<10x16x1xf32>
    %33 = math.exp %32 : vector<10x16x1xf32>
    %cst_18 = arith.constant dense<0.000000e+00> : vector<16x1xf32>
    %34 = vector.multi_reduction <add>, %33, %cst_18 [0] : vector<10x16x1xf32> to vector<16x1xf32>
    %35 = vector.shape_cast %34 : vector<16x1xf32> to vector<1x16x1xf32>
    %36 = vector.broadcast %35 : vector<1x16x1xf32> to vector<10x16x1xf32>
    %37 = arith.divf %33, %36 : vector<10x16x1xf32>
    %c0_19 = arith.constant 0 : index
    %c0_20 = arith.constant 0 : index
    %c0_21 = arith.constant 0 : index
    %38 = vector.load %arg8[%c0_19, %c0_20, %c0_21] : memref<10x16x1xf32, #tpu.memory_space<vmem>>, vector<10x16x1xf32>
    tpu.vector_store %arg8[%c0_19, %c0_20, %c0_21], %37 {strides = array<i32>} : memref<10x16x1xf32, #tpu.memory_space<vmem>>, vector<10x16x1xf32>,
    return
  }
  func.func @transform_0(%arg0: i32) -> (i32, i32) {
    %c0_i32 = arith.constant 0 : i32
    %c0_i32_0 = arith.constant 0 : i32
    return %arg0, %c0_i32 : i32, i32
  }
  func.func @transform_1(%arg0: i32) -> (i32, i32, i32) {
    %c0_i32 = arith.constant 0 : i32
    %c0_i32_0 = arith.constant 0 : i32
    %c0_i32_1 = arith.constant 0 : i32
    return %c0_i32, %arg0, %c0_i32_0 : i32, i32, i32
  }
  func.func @transform_2(%arg0: i32) -> (i32, i32) {
    %c0_i32 = arith.constant 0 : i32
    %c0_i32_0 = arith.constant 0 : i32
    return %arg0, %c0_i32 : i32, i32
  }
  func.func @transform_3(%arg0: i32) -> (i32, i32) {
    %c0_i32 = arith.constant 0 : i32
    %c0_i32_0 = arith.constant 0 : i32
    %c0_i32_1 = arith.constant 0 : i32
    return %c0_i32, %c0_i32_0 : i32, i32
  }
  func.func @transform_4(%arg0: i32) -> (i32, i32) {
    %c0_i32 = arith.constant 0 : i32
    %c0_i32_0 = arith.constant 0 : i32
    %c0_i32_1 = arith.constant 0 : i32
    return %c0_i32, %c0_i32_0 : i32, i32
  }
  func.func @transform_5(%arg0: i32) -> (i32, i32) {
    %c0_i32 = arith.constant 0 : i32
    %c0_i32_0 = arith.constant 0 : i32
    %c0_i32_1 = arith.constant 0 : i32
    return %c0_i32, %c0_i32_0 : i32, i32
  }
  func.func @transform_6(%arg0: i32) -> (i32, i32) {
    %c0_i32 = arith.constant 0 : i32
    %c0_i32_0 = arith.constant 0 : i32
    %c0_i32_1 = arith.constant 0 : i32
    return %c0_i32, %c0_i32_0 : i32, i32
  }
  func.func @transform_7(%arg0: i32) -> (i32, i32, i32) {
    %c0_i32 = arith.constant 0 : i32
    %c0_i32_0 = arith.constant 0 : i32
    %c0_i32_1 = arith.constant 0 : i32
    return %c0_i32, %arg0, %c0_i32_0 : i32, i32, i32
  }
}

</mosaic_0001>

<bundles_post_ra>
// kernel: tpu_custom_call.1
= control target key start
LH: loop header
LB: loop body
LE: loop exit
PB: predicated region body
PF: predicated region fallthrough
CT: control target
= control target key end

     0   :  { %s2335_s0 = inlined_call_operand.hbm [shape: bf16[32,32], index: 0, kind: input, shape index: {}]   ;;  %s2336_s1 = inlined_call_operand.hbm [shape: bf16[10,32,64], index: 1, kind: input, shape index: {}]   ;;  %s2337_s2 = inlined_call_operand.vmem [shape: s32[32,1], index: 2, kind: input, shape index: {}]   ;;  %s2338_s3 = inlined_call_operand.hbm [shape: bf16[32,64], index: 3, kind: input, shape index: {}]   ;;  %s2339_s4 = inlined_call_operand.vmem [shape: bf16[64,64], index: 4, kind: input, shape index: {}]   ;;  %s2340_s5 = inlined_call_operand.vmem [shape: f32[1,64], index: 5, kind: input, shape index: {}]   ;;  %s2341_s6 = inlined_call_operand.vmem [shape: f32[1,64], index: 6, kind: input, shape index: {}]   ;;  %s2342_s7 = inlined_call_operand.vmem [shape: f32[10,32,1], index: 7, kind: output, shape index: {}]  }
   0x1   :  { %2345 = sst [smem:[#allocation14_spill]] %s2335_s0 }
   0x2   :  { %12 = vsyncpa [#allocation3], 0 }
   0x3   :  { %14 = vsyncpa [#allocation3 + $0x1], 0 }
   0x4   :  { %15 = vsyncpa [#allocation5], 0 }
   0x5   :  { %17 = vsyncpa [#allocation5 + $0x1], 0  ;;  %s1746_s24 = smov 0   ;;  %s1748_s25 = smov 0  }
   0x6   :  { %s1750_s26 = smov 0   ;;  %s1752_s27 = smov 0  }
   0x7 LB: > { %s1765_s28 = sadd.s32 4294967295, %s1690_s27   ;;  %s1768_s29 = sadd.s32 1, %s1690_s27   ;;  %s1690_s27 = sphi %s1752_s27, %s2358_s27   ;;  %s1686_s26 = sphi %s1750_s26, %s2357_s26   ;;  %s1682_s25 = sphi %s1748_s25, %s2356_s25   ;;  %s1678_s24 = sphi %s1746_s24, %s2355_s24  }
   0x8   : > { %s27_s30 = ssub.s32 %s1690_s27, %s1768_s29  ;;  %s30_s8 = sadd.s32 1, %s1686_s26 }
   0x9   : > { %p28_p0 = scmp.eq.s32.totalorder %s27_s30, 0  ;;  %p37_p1 = scmp.ne.s32.totalorder %s1686_s26, %s1682_s25 }
   0xa   : > { %p38_p2 = scmp.eq.s32.totalorder %s1690_s27, 0  ;;  %p43_p3 = scmp.ne.s32.totalorder %s1682_s25, %s1678_s24 }
   0xb   : > { %s1778_s9 = scalar_select %p28_p0, %s1686_s26, %s30_s8  }
   0xc   : > { %p1780_p4 = por %p38_p2, %p37_p1  ;;  %p2344_p5 = scmp.eq.s32.totalorder %s1765_s28, 0 }
   0xd   : > { %p203_p6 = scmp.eq.s32.totalorder %s1765_s28, 1  ;;  %p1313_p7 = scmp.ge.s32.totalorder %s1690_s27, 1 }
   0xe   : > { %p1789_p8 = por %p2344_p5, %p43_p3  ;;  %p216_p9 = scmp.lt.s32.totalorder %s1690_s27, 3 }
   0xf   : > { %p1794_p10 = por %p203_p6, %p37_p1  ;;  %s1692_s14 = smov [#allocation6]  }
  0x10   : > { %s2347_s11 = scalar_select %p1789_p8, 1, 0 }
  0x11   : > { %s2348_s12 = scalar_select %p1794_p10, 1, 0 }
  0x12   : > { %p1798_p11 = pnand %p1313_p7, %p216_p9  ;;  %s228_s15 = sshll.u32 %s1692_s14, 4  ;;  %s229_s15 = int_to_ptr.vmem [resolvable:$true] %s228_s15 }
  0x13   : > { %s1607_s16 = scalar_lea.vmem %s229_s15, 256  ;;  %p1615_p6 = scmp.lt.s32.totalorder %s229_s15, %s229_s15 }
  0x14   : > { %p1444_p12 = pneg %p1798_p11  ;;  %p1608_p2 = scmp.ne.s32.totalorder %s229_s15, %s1607_s16 }
  0x15   : > { %p1616_p8 = scmp.lt.s32.totalorder %s1607_s16, %s1607_s16 }
  0x16   : > { %p1445_p13 = pnand %p1444_p12, %p2344_p5 }
  0x17   : > { %p1617_p10 = por %p1616_p8, %p1615_p6 }
  0x18   : > { %p1598_p0 = pneg %p1445_p13 }
  0x1a   : > { %p1610_p3 = pnand %p1608_p2, %p1598_p0 }
  0x1c   : > { %p1611_p1 = pneg %p1610_p3 }
  0x1e   : > { %p1618_p7 = pnand %p1617_p10, %p1611_p1 }
  0x20   : > { %1621 = shalt.err (!%p1618_p7)
}
  0x21   : > { %s1693_s17 = smov 64   ;;  %s1694_s18 = smov 4  }
  0x22   : > { %1447 = dma.hbm_to_vmem [thread:$0]  (!%p1445_p13), %s2338_s3, 256, %s229_s15, [#allocation5], %s1693_s17, %s1693_s17, %s1694_s18  }
  0x23   : > { %p1315_p9 = scmp.ge.s32.totalorder %s1690_s27, 2 }
  0x24   : > { %s1811_s21 = sand.u32 (!%p1315_p9), 1, %s1686_s26   ;;  %s1362_s22 = sshll.u32 (!%p1315_p9), %s1690_s27, 7 }
  0x25   : > { %247 = sbr.rel (%p1315_p9) target bundleno = 80 (0x50), region = 32  ;;  %s1316_s23 = sshll.u32 (!%p1315_p9), %s1811_s21, 3 }
  0x26   : > { %s2350_s0 = sld [smem:[#allocation14_spill]] (!%p1315_p9)  ;;  %s255_s14 = scalar_lea.vmem (!%p1315_p9), [#allocation2], %s1316_s23 }
  0x27   : > { %s262_s15 = sshll.u32 (!%p1315_p9), %s255_s14, 4  ;;  %s252_s16 = scalar_lea.sflag (!%p1315_p9), [#allocation3], %s1811_s21  ;;  %s1822_s15 = int_to_ptr.vmem [resolvable:$true] %s262_s15 }
  0x2c   : > { %s1820_s8 = scalar_lea.hbm %s2350_s0, %s1362_s22  ;;  %s1626_s20 = scalar_lea.hbm %s2350_s0, 256 }
  0x2d   : > { %s1622_s17 = scalar_lea.hbm %s1820_s8, 128  ;;  %p1627_p13 = scmp.lt.s32.totalorder %s1820_s8, %s2350_s0 }
  0x2e   : > { %p1623_p8 = scmp.ne.s32.totalorder %s1820_s8, %s1622_s17  ;;  %p1628_p0 = scmp.lt.s32.totalorder %s1626_s20, %s1622_s17 }
  0x30   : > { %p1624_p10 = pnand %p1623_p8, %p1780_p4  ;;  %p1629_p2 = por %p1628_p0, %p1627_p13 }
  0x32   : > { %p1625_p12 = pneg %p1624_p10 }
  0x34   : > { %p1630_p3 = pnand %p1629_p2, %p1625_p12 }
  0x36   : > { %1633 = shalt.err (!%p1630_p3)
}
  0x37   : > { %s1634_s23 = scalar_lea.vmem %s1822_s15, 128  ;;  %s1695_s14 = smov [#allocation2]  }
  0x38   : > { %p1635_p1 = scmp.ne.s32.totalorder %s1822_s15, %s1634_s23  ;;  %s1638_s18 = sshll.u32 %s1695_s14, 4  ;;  %s1639_s18 = int_to_ptr.vmem [resolvable:$false] %s1638_s18 }
  0x39   : > { %s1640_s19 = scalar_lea.vmem %s1639_s18, 256  ;;  %p1641_p9 = scmp.lt.s32.totalorder %s1822_s15, %s1639_s18 }
  0x3a   : > { %p1636_p6 = pnand %p1635_p1, %p1780_p4  ;;  %p1642_p8 = scmp.lt.s32.totalorder %s1640_s19, %s1634_s23 }
  0x3c   : > { %p1637_p7 = pneg %p1636_p6  ;;  %p1643_p10 = por %p1642_p8, %p1641_p9 }
  0x3e   : > { %p1644_p5 = pnand %p1643_p10, %p1637_p7 }
  0x40   : > { %1647 = shalt.err (!%p1644_p5)
}
  0x41   : > { %s1696_s17 = smov 64   ;;  %s1697_s20 = smov 4  }
  0x42   : > { %1431 = dma.hbm_to_vmem [thread:$0]  (%p1780_p4), %s1820_s8, 128, %s1822_s15, %s252_s16, %s1696_s17, %s1696_s17, %s1697_s20  }
  0x43   : > { %s272_s24 = sand.u32 1, %s1690_s27   ;;  %s1426_s30 = smul.u32 80, %s1811_s21 }
  0x44   : > { %s1432_s23 = scalar_select %p1780_p4, [#allocation0], [#allocation10] }
  0x45   : > { %s282_s19 = scalar_lea.hbm %s2336_s1, %s1362_s22  ;;  %s1698_s8 = smov 256  }
  0x46   : > { %1433 = sst [smem:[#allocation9]] (%p1780_p4), %s1698_s8  ;;  %s276_s16 = scalar_lea.vmem [#allocation4], %s1426_s30 }
  0x47   : > { %s287_s15 = sld [smem:[%s1432_s23]]   ;;  %s295_s17 = sshll.u32 %s276_s16, 4  ;;  %s296_s17 = int_to_ptr.vmem [resolvable:$true] %s295_s17 }
  0x48   : > { %s1699_s20 = smov 128   ;;  %s1700_s0 = smov 2  }
  0x49   : > { %1434 = sst [smem:[#allocation9 + $0x1]] (%p1780_p4), %s1699_s20  ;;  %s1701_s27 = smov 64  }
  0x4a   : > { %1435 = sst [smem:[#allocation9 + $0x2]] (%p1780_p4), %s1700_s0  ;;  %s1702_s22 = smov 4  }
  0x4b   : > { %1436 = sst [smem:[#allocation9 + $0x3]] (%p1780_p4), %s1701_s27  ;;  %s273_s30 = scalar_lea.sflag [#allocation5], %s272_s24 }
  0x4c   : > { %1437 = sst [smem:[#allocation9 + $0x4]] (%p1780_p4), %s1701_s27  ;;  %s1703_s14 = smov 131072  }
  0x4d   : > { %s1321_s21 = sshll.u32 %s287_s15, 26  ;;  %1438 = sst [smem:[#allocation9 + $0x5]] (%p1780_p4), %s1702_s22 }
  0x4e   : > { %s1322_s23 = sadd.s32 134217728, %s1321_s21 }
  0x4f   : > { %1439 = dma.general (%p1780_p4), %s282_s19, 1280, %s296_s17, %s273_s30, %s1703_s14, [#allocation9], %s1322_s23, 0  }
  0x50 PF: > { %329 = sbr.rel (%p1798_p11) target bundleno = 583 (0x247), region = 48  ;;  %s1873_s0 = sand.u32 (!%p1798_p11), 1, %s1682_s25  }
  0x51   : > { %s1324_s18 = sshll.u32 (!%p1798_p11), %s1873_s0, 3  ;;  %s332_s8 = scalar_lea.sflag (!%p1798_p11), [#allocation3], %s1873_s0 }
  0x52   : > { %s335_s15 = scalar_lea.vmem (!%p1798_p11), [#allocation2], %s1324_s18  ;;  %p2351_p5 = scmp.ne.s32.totalorder (!%p1798_p11), %s2347_s11, 0 }
  0x55   : > { %1665 = dma.done.wait (%p2351_p5), %s332_s8, 128  }
  0x56   : > { %1667 = vsyncadd (%p2351_p5), %s332_s8, 4294967168  ;;  %s340_s10 = sand.u32 1, %s1765_s28   ;;  %s1427_s13 = smul.u32 80, %s1873_s0 }
  0x57   : > { %s341_s24 = scalar_lea.sflag [#allocation5], %s340_s10 }
  0x58   : > { %s1883_s19 = scalar_lea.vmem [#allocation4], %s1427_s13 }
  0x59   : > { %1669 = dma.done.wait (%p2351_p5), %s341_s24, 1280  }
  0x5a   : > { %1671 = vsyncadd (%p2351_p5), %s341_s24, 4294966016  ;;  %p2352_p4 = scmp.eq.s32.totalorder %s1765_s28, 0 }
  0x5c   : > { %1673 = dma.done.wait (%p2352_p4), [#allocation5], 256   ;;  %p2353_p11 = pmov %p2352_p4 }
  0x5d   : > { %v1704_v0 = vmov 0.0   ;;  %vm1705_vm0 = vmmov 0   ;;  %v1495_v1 = vld [vmem:[#allocation6 + $0x8] sm:$0xff]   ;;  %v1497_v3 = vld [vmem:[#allocation6] sm:$0xff]   ;;  %v1499_v5 = vld [vmem:[%s335_s15] sm:$0xff]   ;;  %vm421_vm1 = vcmask 261120  }
  0x5e   : > { %1675 = vsyncadd (%p2353_p11), [#allocation5], 4294967040  ;;  %1382 = vmatprep.subr.bf16.mxu0 %v1704_v0  ;;  %1386 = vmatprep.mubr.msk.bf16.mxu0 %vm1705_vm0, %v1704_v0  ;;  %v1496_v2 = vld [vmem:[%s2339_s4 + $0x18] sm:$0xff]   ;;  %v1498_v4 = vld [vmem:[%s2339_s4 + $0x10] sm:$0xff]   ;;  %vm568_vm2 = vcmask 523264   ;;  %s1326_s15 = sshll.u32 %s1765_s28, 1 }
  0x5f   : > { %1383 = vmatpush3.bf16.msra.mxu0 %v1495_v1  ;;  %1418 = vmatprep.subr.bf16.mxu1 %v1496_v2  ;;  %v1500_v6 = vld [vmem:[%s2339_s4 + $0x8] sm:$0xff]   ;;  %v1502_v7 = vld [vmem:[%s1883_s19 + $0x20] sm:$0xff]   ;;  %v1506_v11 = vld [vmem:[%s1883_s19 + $0x30] sm:$0xff]   ;;  %p391_p12 = scmp.lt.s32.totalorder %s1326_s15, 3  ;;  %vm908_vm4 = vcmask 7168   ;;  %s1428_s16 = smul.u32 160, %s1873_s0 }
  0x60   : > { %1384 = vmatprep.subr.bf16.mxu0 %v1704_v0  ;;  %1422 = vmatpush3.bf16.msra.mxu1 %v1496_v2  ;;  %v1501_v8 = vld [vmem:[%s2339_s4] sm:$0xff]   ;;  %v1503_v10 = vld [vmem:[%s1883_s19 + $0x28] sm:$0xff]   ;;  %v1507_v14 = vld [vmem:[%s1883_s19 + $0x38] sm:$0xff]   ;;  %p2354_p13 = scmp.ne.s32.totalorder %s2348_s12, 0 }
  0x61   : > { %1419 = vmatprep.subr.bf16.mxu1 %v1498_v4  ;;  %v1504_v9 = vld [vmem:[%s1883_s19] sm:$0xff]   ;;  %1406 = vmatprep.mubr.msk.bf16.mxu1 %vm568_vm2, %v1502_v7  ;;  %v1505_v12 = vld [vmem:[%s1883_s19 + $0x8] sm:$0xff]   ;;  %v1508_v13 = vld [vmem:[%s1883_s19 + $0x10] sm:$0xff]   ;;  %s2360_s15 = smov (!%p391_p12, %s1326_s15), 3  ;;  %s2229_s17 = scalar_lea.vmem [#allocation7], %s1428_s16 }
  0x62   : > { %v1510_v15 = vld [vmem:[%s1883_s19 + $0x40] sm:$0xff]   ;;  %v1509_v16 = vld [vmem:[%s1883_s19 + $0x18] sm:$0xff]   ;;  %v1511_v17 = vld [vmem:[%s1883_s19 + $0x48] sm:$0xff]   ;;  %s1327_s10 = sshll.u32 %s2360_s15, 3  ;;  %s1364_s0 = sshll.u32 (%p2354_p13), %s1765_s28, 4 }
  0x63   : > { %1385 = vmatpush3.bf16.msra.mxu0 %v1497_v3  ;;  %v1932_v23 = vld [vmem:[%s2340_s5] ss:$0 sm:$0xff]  ;;  %s394_s19 = scalar_lea.vmem %s2337_s2, %s1327_s10  ;;  %s2283_s27 = scalar_lea.vmem (%p2354_p13), %s2342_s7, %s1364_s0 }
  0x64   : > { %1390 = vmatprep.subr.bf16.mxu0 %v1496_v2  ;;  %1423 = vmatpush3.bf16.msra.mxu1 %v1498_v4  ;;  %v1960_v61 = vld [vmem:[%s2341_s6] ss:$0 sm:$0xff] }
  0x65   : > { %1420 = vmatprep.subr.bf16.mxu1 %v1500_v6 }
  0x66   : > { %1387 = vmatmul.mubr.msk.bf16.vlgmr.msra.gmra.mxu0 %vm421_vm1, %v1499_v5 }
  0x67   : > { %1391 = vmatpush3.bf16.msra.mxu0 %v1496_v2  ;;  %1398 = vmatprep.mubr.msk.bf16.mxu0 %vm568_vm2, %v1504_v9 }
  0x68   : > { %1392 = vmatprep.subr.bf16.mxu0 %v1498_v4  ;;  %1424 = vmatpush3.bf16.msra.mxu1 %v1500_v6 }
  0x69   : > { %1421 = vmatprep.subr.bf16.mxu1 %v1501_v8 }
  0x6b   : > { %1393 = vmatpush3.bf16.msra.mxu0 %v1498_v4 }
  0x6c   : > { %1394 = vmatprep.subr.bf16.mxu0 %v1500_v6  ;;  %1425 = vmatpush3.bf16.msra.mxu1 %v1501_v8 }
  0x6f   : > { %1395 = vmatpush3.bf16.msra.mxu0 %v1500_v6  ;;  %1407 = vmatmul.mubr.msk.bf16.vlgmr.msra.gmra.mxu1 %vm568_vm2, %v1503_v10 }
  0x70   : > { %1396 = vmatprep.subr.bf16.mxu0 %v1501_v8  ;;  %1410 = vmatprep.mubr.msk.bf16.mxu1 %vm568_vm2, %v1506_v11 }
  0x73   : > { %1397 = vmatpush3.bf16.msra.mxu0 %v1501_v8 }
  0x76   : > { %1399 = vmatmul.mubr.msk.bf16.vlgmr.msra.gmra.mxu0 %vm568_vm2, %v1505_v12 }
  0x77   : > { %1402 = vmatprep.mubr.msk.bf16.mxu0 %vm568_vm2, %v1508_v13  ;;  %1411 = vmatmul.mubr.msk.bf16.gmra.mxu1 %vm568_vm2, %v1507_v14 }
  0x78   : > { %1414 = vmatprep.mubr.msk.bf16.mxu1 %vm568_vm2, %v1510_v15 }
  0x7e   : > { %1403 = vmatmul.mubr.msk.bf16.gmra.mxu0 %vm568_vm2, %v1509_v16 }
  0x7f   : > { %1415 = vmatmul.mubr.msk.bf16.gmra.mxu1 %vm568_vm2, %v1511_v17 }
 0x126   : > { %v1925_v18 = vpop.f32.mrf.mxu0 }
 0x128   : > { %v1388_v19 = vpop.f32.mrf.mxu0 }
 0x12a   : > { %v1927_v20 = vpop.f32.mrf.mxu0 }
 0x12c   : > { %v1389_v21 = vpop.f32.mrf.mxu0 }
 0x12f   : > { %v1408_v22 = vpop.f32.mrf.mxu1 }
 0x130   : > { %v722_v24 = vadd.f32 %v1408_v22, %v1925_v18 }
 0x131   : > { %v665_v25 = vpop.f32.mrf.mxu1 }
 0x132   : > { %v749_v26 = vadd.f32 %v1932_v23, %v722_v24  ;;  %v720_v27 = vadd.f32 %v665_v25, %v1925_v18 }
 0x133   : > { %v1409_v28 = vpop.f32.mrf.mxu1 }
 0x134   : > { %1512 = vtanh.f32 %v749_v26  ;;  %v747_v29 = vadd.f32 %v1932_v23, %v720_v27  ;;  %v723_v30 = vadd.f32 %v1409_v28, %v1927_v20 }
 0x135   : > { %v668_v31 = vpop.f32.mrf.mxu1 }
 0x136   : > { %v1400_v32 = vpop.f32.mrf.mxu0  ;;  %1514 = vtanh.f32 %v747_v29  ;;  %v750_v33 = vadd.f32 %v1932_v23, %v723_v30  ;;  %v721_v34 = vadd.f32 %v668_v31, %v1927_v20 }
 0x137   : > { %v714_v35 = vadd.f32 %v1400_v32, %v1925_v18  ;;  %v1412_v36 = vpop.f32.mrf.mxu1 }
 0x138   : > { %v633_v37 = vpop.f32.mrf.mxu0  ;;  %1516 = vtanh.f32 %v750_v33  ;;  %v748_v38 = vadd.f32 %v1932_v23, %v721_v34  ;;  %v726_v40 = vadd.f32 %v1412_v36, %v1925_v18 }
 0x139   : > { %v741_v39 = vadd.f32 %v1932_v23, %v714_v35  ;;  %v712_v41 = vadd.f32 %v633_v37, %v1925_v18  ;;  %v681_v42 = vpop.f32.mrf.mxu1 }
 0x13a   : > { %v1401_v43 = vpop.f32.mrf.mxu0  ;;  %1518 = vtanh.f32 %v748_v38  ;;  %v753_v44 = vadd.f32 %v1932_v23, %v726_v40  ;;  %v724_v45 = vadd.f32 %v681_v42, %v1925_v18 }
 0x13b   : > { %v715_v46 = vadd.f32 %v1401_v43, %v1927_v20  ;;  %1520 = vtanh.f32 %v741_v39  ;;  %v739_v47 = vadd.f32 %v1932_v23, %v712_v41  ;;  %v1413_v48 = vpop.f32.mrf.mxu1 }
 0x13c   : > { %v636_v49 = vpop.f32.mrf.mxu0  ;;  %1522 = vtanh.f32 %v753_v44  ;;  %v727_v51 = vadd.f32 %v1413_v48, %v1927_v20  ;;  %v751_v52 = vadd.f32 %v1932_v23, %v724_v45 }
 0x13d   : > { %v742_v50 = vadd.f32 %v1932_v23, %v715_v46  ;;  %1524 = vtanh.f32 %v739_v47  ;;  %v713_v53 = vadd.f32 %v636_v49, %v1927_v20  ;;  %v684_v54 = vpop.f32.mrf.mxu1 }
 0x13e   : > { %v1404_v55 = vpop.f32.mrf.mxu0  ;;  %v754_v58 = vadd.f32 %v1932_v23, %v727_v51  ;;  %v725_v59 = vadd.f32 %v684_v54, %v1927_v20 }
 0x13f   : > { %v1416_v56 = vpop.f32.mrf.mxu1  ;;  %1526 = vtanh.f32 %v742_v50  ;;  %v718_v60 = vadd.f32 %v1404_v55, %v1925_v18  ;;  %v740_v63 = vadd.f32 %v1932_v23, %v713_v53 }
 0x140   : > { %v649_v57 = vpop.f32.mrf.mxu0  ;;  %1528 = vtanh.f32 %v751_v52  ;;  %v752_v5 = vadd.f32 %v1932_v23, %v725_v59  ;;  %v730_v36 = vadd.f32 %v1416_v56, %v1925_v18 }
 0x141   : > { %v1513_v62 = vpop.eup %1512  ;;  %v697_v0 = vpop.f32.mrf.mxu1  ;;  %1530 = vtanh.f32 %v754_v58  ;;  %v745_v6 = vadd.f32 %v1932_v23, %v718_v60  ;;  %v716_v9 = vadd.f32 %v649_v57, %v1925_v18 }
 0x142   : > { %v1405_v1 = vpop.f32.mrf.mxu0  ;;  %v796_v4 = vmul.f32 %v1513_v62, %v1960_v61  ;;  %1532 = vtanh.f32 %v740_v63  ;;  %v728_v26 = vadd.f32 %v697_v0, %v1925_v18  ;;  %v757_v18 = vadd.f32 %v1932_v23, %v730_v36 }
 0x143   : > { %v1515_v2 = vpop.eup %1514  ;;  %v719_v3 = vadd.f32 %v1405_v1, %v1927_v20  ;;  %v1417_v7 = vpop.f32.mrf.mxu1  ;;  %1534 = vtanh.f32 %v752_v5  ;;  %v743_v25 = vadd.f32 %v1932_v23, %v716_v9 }
 0x144   : > { %v652_v10 = vpop.f32.mrf.mxu0  ;;  %v836_v11 = vsel %vm568_vm2, %v796_v4, 0.0  ;;  %v794_v12 = vmul.f32 %v1515_v2, %v1960_v61  ;;  %1536 = vtanh.f32 %v745_v6  ;;  %v755_v37 = vadd.f32 %v1932_v23, %v728_v26 }
 0x145   : > { %v1517_v8 = vpop.eup %1516  ;;  %837 = vadd.xlane.f32.xlu0 %v836_v11  ;;  %v746_v15 = vadd.f32 %v1932_v23, %v719_v3  ;;  %v717_v17 = vadd.f32 %v652_v10, %v1927_v20  ;;  %v700_v19 = vpop.f32.mrf.mxu1  ;;  %v731_v40 = vadd.f32 %v1417_v7, %v1927_v20 }
 0x146   : > { %v797_v13 = vmul.f32 %v1517_v8, %v1960_v61  ;;  %v830_v27 = vsel %vm568_vm2, %v794_v12, 0.0  ;;  %v729_v30 = vadd.f32 %v700_v19, %v1927_v20 }
 0x147   : > { %v1519_v14 = vpop.eup %1518  ;;  %1538 = vtanh.f32 %v746_v15  ;;  %v744_v31 = vadd.f32 %v1932_v23, %v717_v17  ;;  %v758_v20 = vadd.f32 %v1932_v23, %v731_v40 }
 0x148   : > { %v1521_v16 = vpop.eup %1520  ;;  %v839_v21 = vsel %vm568_vm2, %v797_v13, 0.0  ;;  %v795_v22 = vmul.f32 %v1519_v14, %v1960_v61  ;;  %1540 = vtanh.f32 %v743_v25  ;;  %v756_v41 = vadd.f32 %v1932_v23, %v729_v30  ;;  %v2025_v30 = vld [vmem:[%s394_s19 + $0x8] sm:$0xff] }
 0x149   : > { %v1523_v24 = vpop.eup %1522  ;;  %840 = vadd.xlane.f32.xlu1 %v839_v21  ;;  %831 = vadd.xlane.f32.xlu0 %v830_v27  ;;  %v788_v34 = vmul.f32 %v1521_v16, %v1960_v61  ;;  %1542 = vtanh.f32 %v744_v31  ;;  %vm879_vm8 = vcmp.gt.s32.totalorder %v2025_v30, 5  ;;  %vm877_vm10 = vcmp.gt.s32.totalorder %v2025_v30, 4 }
 0x14a   : > { %v1525_v28 = vpop.eup %1524  ;;  %v800_v29 = vmul.f32 %v1523_v24, %v1960_v61  ;;  %v833_v33 = vsel %vm568_vm2, %v795_v22, 0.0  ;;  %1544 = vtanh.f32 %v755_v37  ;;  %vm871_vm13 = vcmp.gt.s32.totalorder %v2025_v30, 1 }
 0x14b   : > { %v786_v38 = vmul.f32 %v1525_v28, %v1960_v61  ;;  %v812_v42 = vsel %vm568_vm2, %v788_v34, 0.0  ;;  %1546 = vtanh.f32 %v756_v41  ;;  %v2023_v28 = vld [vmem:[%s394_s19] sm:$0xff]  ;;  %vm883_vm14 = vcmp.gt.s32.totalorder %v2025_v30, 7 }
 0x14c   : > { %v848_v32 = vsel %vm568_vm2, %v800_v29, 0.0  ;;  %v1527_v35 = vpop.eup %1526  ;;  %1548 = vtanh.f32 %v757_v18  ;;  %vm878_vm3 = vcmp.gt.s32.totalorder %v2023_v28, 5  ;;  %vm870_vm5 = vcmp.gt.s32.totalorder %v2023_v28, 1 }
 0x14d   : > { %834 = vadd.xlane.f32.xlu1 %v833_v33  ;;  %v1529_v39 = vpop.eup %1528  ;;  %849 = vadd.xlane.f32.xlu0 %v848_v32  ;;  %v789_v43 = vmul.f32 %v1527_v35, %v1960_v61  ;;  %v806_v45 = vsel %vm568_vm2, %v786_v38, 0.0  ;;  %1550 = vtanh.f32 %v758_v20  ;;  %vm874_vm6 = vcmp.gt.s32.totalorder %v2023_v28, 3 }
 0x14e   : > { %v1531_v44 = vpop.eup %1530  ;;  %v798_v46 = vmul.f32 %v1529_v39, %v1960_v61  ;;  %vm876_vm7 = vcmp.gt.s32.totalorder %v2023_v28, 4  ;;  %vm882_vm9 = vcmp.gt.s32.totalorder %v2023_v28, 7  ;;  %vm868_vm11 = vcmp.gt.s32.totalorder %v2023_v28, 0 }
 0x14f   : > { %v1533_v47 = vpop.eup %1532  ;;  %v815_v48 = vsel %vm568_vm2, %v789_v43, 0.0  ;;  %v801_v49 = vmul.f32 %v1531_v44, %v1960_v61  ;;  %vm880_vm12 = vcmp.gt.s32.totalorder %v2023_v28, 6  ;;  %vm869_vm15 = vcmp.gt.s32.totalorder %v2025_v30, 0 }
 0x150   : > { %v1535_v50 = vpop.eup %1534  ;;  %v842_v51 = vsel %vm568_vm2, %v798_v46, 0.0  ;;  %v787_v52 = vmul.f32 %v1533_v47, %v1960_v61  ;;  %vm875_vm0 = vcmp.gt.s32.totalorder %v2025_v30, 3  ;;  %vm881_vm1 = vcmp.gt.s32.totalorder %v2025_v30, 6 }
 0x151   : > { %813 = vadd.xlane.f32.xlu1 %v812_v42  ;;  %807 = vadd.xlane.f32.xlu0 %v806_v45  ;;  %v1537_v53 = vpop.eup %1536  ;;  %v851_v55 = vsel %vm568_vm2, %v801_v49, 0.0  ;;  %v799_v23 = vmul.f32 %v1535_v50, %v1960_v61 }
 0x152   : > { %v809_v56 = vsel %vm568_vm2, %v787_v52, 0.0  ;;  %v792_v57 = vmul.f32 %v1537_v53, %v1960_v61 }
 0x153   : > { %v845_v59 = vsel %vm568_vm2, %v799_v23, 0.0 }
 0x154   : > { %v1539_v54 = vpop.eup %1538  ;;  %v824_v63 = vsel %vm568_vm2, %v792_v57, 0.0 }
 0x155   : > { %816 = vadd.xlane.f32.xlu1 %v815_v48  ;;  %843 = vadd.xlane.f32.xlu0 %v842_v51  ;;  %v1541_v58 = vpop.eup %1540  ;;  %v793_v60 = vmul.f32 %v1539_v54, %v1960_v61 }
 0x156   : > { %v1543_v62 = vpop.eup %1542  ;;  %v790_v0 = vmul.f32 %v1541_v58, %v1960_v61 }
 0x157   : > { %v1545_v1 = vpop.eup %1544  ;;  %v827_v2 = vsel %vm568_vm2, %v793_v60, 0.0  ;;  %v791_v3 = vmul.f32 %v1543_v62, %v1960_v61 }
 0x158   : > { %v1547_v4 = vpop.eup %1546  ;;  %v818_v5 = vsel %vm568_vm2, %v790_v0, 0.0  ;;  %v802_v6 = vmul.f32 %v1545_v1, %v1960_v61 }
 0x159   : > { %852 = vadd.xlane.f32.xlu1 %v851_v55  ;;  %810 = vadd.xlane.f32.xlu0 %v809_v56  ;;  %v1549_v7 = vpop.eup %1548  ;;  %v821_v8 = vsel %vm568_vm2, %v791_v3, 0.0  ;;  %v803_v9 = vmul.f32 %v1547_v4, %v1960_v61 }
 0x15a   : > { %v1551_v10 = vpop.eup %1550  ;;  %v854_v11 = vsel %vm568_vm2, %v802_v6, 0.0  ;;  %v804_v12 = vmul.f32 %v1549_v7, %v1960_v61 }
 0x15b   : > { %v857_v13 = vsel %vm568_vm2, %v803_v9, 0.0  ;;  %v805_v14 = vmul.f32 %v1551_v10, %v1960_v61 }
 0x15c   : > { %v860_v15 = vsel %vm568_vm2, %v804_v12, 0.0 }
 0x15d   : > { %846 = vadd.xlane.f32.xlu1 %v845_v59  ;;  %825 = vadd.xlane.f32.xlu0 %v824_v63  ;;  %v863_v16 = vsel %vm568_vm2, %v805_v14, 0.0  ;;  %vm872_vm2 = vcmp.gt.s32.totalorder %v2023_v28, 2 }
 0x161   : > { %828 = vadd.xlane.f32.xlu1 %v827_v2  ;;  %819 = vadd.xlane.f32.xlu0 %v818_v5 }
 0x165   : > { %822 = vadd.xlane.f32.xlu1 %v821_v8  ;;  %855 = vadd.xlane.f32.xlu0 %v854_v11 }
 0x169   : > { %858 = vadd.xlane.f32.xlu1 %v857_v13  ;;  %861 = vadd.xlane.f32.xlu0 %v860_v15 }
 0x16d   : > { %864 = vadd.xlane.f32.xlu1 %v863_v16 }
 0x1ce   : > { %v838_v17 = vpop.xlane.xlu0 %837 }
 0x1cf   : > { %v2046_v36 = vsel %vm878_vm3, %v838_v17, -1e+10  ;;  %vm886_vm3 = vcmp.gt.s32.totalorder %v2023_v28, 9 }
 0x1d0   : > { %v917_v18 = vsel %vm908_vm4, %v2046_v36, -inf }
 0x1d2   : > { %v841_v19 = vpop.xlane.xlu1 %840  ;;  %v832_v21 = vpop.xlane.xlu0 %831 }
 0x1d3   : > { %v2054_v38 = vsel %vm876_vm7, %v832_v21, -1e+10  ;;  %v2075_v20 = vsel %vm879_vm8, %v841_v19, -1e+10  ;;  %vm885_vm7 = vcmp.gt.s32.totalorder %v2025_v30, 8  ;;  %vm887_vm8 = vcmp.gt.s32.totalorder %v2025_v30, 9 }
 0x1d4   : > { %v915_v51 = vsel %vm908_vm4, %v2054_v38, -inf  ;;  %v936_v1 = vsel %vm908_vm4, %v2075_v20, -inf }
 0x1d6   : > { %v835_v22 = vpop.xlane.xlu1 %834  ;;  %v850_v24 = vpop.xlane.xlu0 %849 }
 0x1d7   : > { %v2094_v23 = vsel %vm882_vm9, %v850_v24, -1e+10  ;;  %v2098_v56 = vsel %vm877_vm10, %v835_v22, -1e+10 }
 0x1d8   : > { %v934_v4 = vsel %vm908_vm4, %v2098_v56, -inf  ;;  %v921_v9 = vsel %vm908_vm4, %v2094_v23, -inf }
 0x1da   : > { %v814_v25 = vpop.xlane.xlu1 %813  ;;  %v808_v26 = vpop.xlane.xlu0 %807 }
 0x1db   : > { %v2038_v34 = vsel %vm870_vm5, %v814_v25, -1e+10  ;;  %v2056_v39 = vsel %vm868_vm11, %v808_v26, -1e+10  ;;  %vm884_vm5 = vcmp.gt.s32.totalorder %v2023_v28, 8 }
 0x1dc   : > { %v910_v41 = vsel %vm908_vm4, %v2038_v34, -inf  ;;  %v909_v48 = vsel %vm908_vm4, %v2056_v39, -inf }
 0x1de   : > { %v817_v27 = vpop.xlane.xlu1 %816  ;;  %v844_v61 = vpop.xlane.xlu0 %843 }
 0x1df   : > { %v2064_v42 = vsel %vm871_vm13, %v817_v27, -1e+10  ;;  %v2088_v52 = vsel %vm880_vm12, %v844_v61, -1e+10 }
 0x1e0   : > { %v929_v53 = vsel %vm908_vm4, %v2064_v42, -inf  ;;  %v919_v2 = vsel %vm908_vm4, %v2088_v52, -inf }
 0x1e2   : > { %v853_v29 = vpop.xlane.xlu1 %852  ;;  %v811_v31 = vpop.xlane.xlu0 %810 }
 0x1e3   : > { %v2081_v49 = vsel %vm869_vm15, %v811_v31, -1e+10  ;;  %v2117_v5 = vsel %vm883_vm14, %v853_v29, -1e+10 }
 0x1e4   : > { %v928_v60 = vsel %vm908_vm4, %v2081_v49, -inf  ;;  %v940_v16 = vsel %vm908_vm4, %v2117_v5, -inf }
 0x1e6   : > { %v847_v32 = vpop.xlane.xlu1 %846  ;;  %v826_v33 = vpop.xlane.xlu0 %825 }
 0x1e7   : > { %v2041_v35 = vsel %vm874_vm6, %v826_v33, -1e+10  ;;  %vm873_vm6 = vcmp.gt.s32.totalorder %v2025_v30, 2  ;;  %v2125_v10 = vsel %vm881_vm1, %v847_v32, -1e+10 }
 0x1e8   : > { %v913_v37 = vsel %vm908_vm4, %v2041_v35, -inf  ;;  %v938_v21 = vsel %vm908_vm4, %v2125_v10, -inf }
 0x1e9   : > { %v914_v45 = vmax.f32 %v910_v41, %v913_v37 }
 0x1ea   : > { %v829_v40 = vpop.xlane.xlu1 %828  ;;  %v820_v43 = vpop.xlane.xlu0 %819 }
 0x1eb   : > { %v2066_v44 = vsel %vm875_vm0, %v829_v40, -1e+10  ;;  %v892_v46 = vsel %vm872_vm2, %v820_v43, -1e+10  ;;  %v918_v62 = vmax.f32 %v914_v45, %v917_v18 }
 0x1ec   : > { %v932_v47 = vsel %vm908_vm4, %v2066_v44, -inf  ;;  %v911_v50 = vsel %vm908_vm4, %v892_v46, -inf }
 0x1ed   : > { %v912_v54 = vmax.f32 %v909_v48, %v911_v50  ;;  %v933_v57 = vmax.f32 %v929_v53, %v932_v47  ;;  %v922_v14 = vmax.f32 %v918_v62, %v921_v9 }
 0x1ee   : > { %v823_v55 = vpop.xlane.xlu1 %822  ;;  %v856_v58 = vpop.xlane.xlu0 %855 }
 0x1ef   : > { %v2102_v59 = vsel %vm873_vm6, %v823_v55, -1e+10  ;;  %v916_v63 = vmax.f32 %v912_v54, %v915_v51  ;;  %v904_v7 = vsel %vm884_vm5, %v856_v58, -1e+10  ;;  %v937_v11 = vmax.f32 %v933_v57, %v936_v1 }
 0x1f0   : > { %v930_v0 = vsel %vm908_vm4, %v2102_v59, -inf  ;;  %v923_v17 = vsel %vm908_vm4, %v904_v7, -inf }
 0x1f1   : > { %v931_v3 = vmax.f32 %v928_v60, %v930_v0  ;;  %v920_v6 = vmax.f32 %v916_v63, %v919_v2  ;;  %v941_v61 = vmax.f32 %v937_v11, %v940_v16 }
 0x1f2   : > { %v859_v8 = vpop.xlane.xlu1 %858  ;;  %v862_v13 = vpop.xlane.xlu0 %861 }
 0x1f3   : > { %v935_v12 = vmax.f32 %v931_v3, %v934_v4  ;;  %v906_v15 = vsel %vm886_vm3, %v862_v13, -1e+10  ;;  %v924_v22 = vmax.f32 %v920_v6, %v923_v17  ;;  %v2138_v25 = vsel %vm885_vm7, %v859_v8, -1e+10 }
 0x1f4   : > { %v925_v19 = vsel %vm908_vm4, %v906_v15, -inf  ;;  %v942_v32 = vsel %vm908_vm4, %v2138_v25, -inf }
 0x1f5   : > { %v926_v24 = vmax.f32 %v922_v14, %v925_v19  ;;  %v939_v27 = vmax.f32 %v935_v12, %v938_v21 }
 0x1f6   : > { %v865_v26 = vpop.xlane.xlu1 %864 }
 0x1f7   : > { %v2140_v28 = vsel %vm887_vm8, %v865_v26, -1e+10  ;;  %v927_v29 = vmax.f32 %v924_v22, %v926_v24  ;;  %v943_v18 = vmax.f32 %v939_v27, %v942_v32 }
 0x1f8   : > { %v944_v31 = vsel %vm908_vm4, %v2140_v28, -inf }
 0x1f9   : > { %v945_v33 = vmax.f32 %v941_v61, %v944_v31  ;;  %v947_v37 = vsub.f32 %v2056_v39, %v927_v29  ;;  %v949_v40 = vsub.f32 %v2038_v34, %v927_v29  ;;  %v951_v30 = vsub.f32 %v892_v46, %v927_v29 }
 0x1fa   : > { %v953_v41 = vsub.f32 %v2041_v35, %v927_v29  ;;  %v955_v43 = vsub.f32 %v2054_v38, %v927_v29  ;;  %v957_v45 = vsub.f32 %v2046_v36, %v927_v29  ;;  %v959_v50 = vsub.f32 %v2088_v52, %v927_v29 }
 0x1fb   : > { %v967_v47 = vmul.f32 1.442695, %v947_v37  ;;  %v971_v48 = vmul.f32 1.442695, %v949_v40  ;;  %v975_v51 = vmul.f32 1.442695, %v951_v30  ;;  %v2152_v54 = vmax.f32 %v943_v18, %v945_v33 }
 0x1fc   : > { %v979_v53 = vmul.f32 1.442695, %v953_v41  ;;  %v961_v39 = vsub.f32 %v2094_v23, %v927_v29  ;;  %v963_v34 = vsub.f32 %v904_v7, %v927_v29  ;;  %v983_v46 = vmul.f32 1.442695, %v955_v43 }
 0x1fd   : > { %1552 = vpow2.f32 %v967_v47  ;;  %v987_v35 = vmul.f32 1.442695, %v957_v45  ;;  %v948_v38 = vsub.f32 %v2081_v49, %v2152_v54  ;;  %v991_v36 = vmul.f32 1.442695, %v959_v50 }
 0x1fe   : > { %1554 = vpow2.f32 %v971_v48  ;;  %v950_v52 = vsub.f32 %v2064_v42, %v2152_v54  ;;  %v995_v55 = vmul.f32 1.442695, %v961_v39  ;;  %v952_v57 = vsub.f32 %v2102_v59, %v2152_v54 }
 0x1ff   : > { %1556 = vpow2.f32 %v975_v51  ;;  %v999_v23 = vmul.f32 1.442695, %v963_v34  ;;  %v954_v58 = vsub.f32 %v2066_v44, %v2152_v54  ;;  %v965_v60 = vsub.f32 %v906_v15, %v927_v29 }
 0x200   : > { %1558 = vpow2.f32 %v979_v53  ;;  %v969_v62 = vmul.f32 1.442695, %v948_v38  ;;  %v956_v49 = vsub.f32 %v2098_v56, %v2152_v54  ;;  %v973_v63 = vmul.f32 1.442695, %v950_v52 }
 0x201   : > { %1560 = vpow2.f32 %v983_v46  ;;  %v977_v0 = vmul.f32 1.442695, %v952_v57  ;;  %v958_v42 = vsub.f32 %v2075_v20, %v2152_v54  ;;  %v981_v59 = vmul.f32 1.442695, %v954_v58 }
 0x202   : > { %1562 = vpow2.f32 %v987_v35  ;;  %v1003_v1 = vmul.f32 1.442695, %v965_v60  ;;  %v960_v44 = vsub.f32 %v2125_v10, %v2152_v54  ;;  %v985_v2 = vmul.f32 1.442695, %v956_v49 }
 0x203   : > { %1564 = vpow2.f32 %v991_v36  ;;  %v962_v56 = vsub.f32 %v2117_v5, %v2152_v54  ;;  %v989_v4 = vmul.f32 1.442695, %v958_v42  ;;  %v964_v9 = vsub.f32 %v2138_v25, %v2152_v54 }
 0x204   : > { %1566 = vpow2.f32 %v995_v55  ;;  %v993_v10 = vmul.f32 1.442695, %v960_v44  ;;  %v966_v13 = vsub.f32 %v2140_v28, %v2152_v54 }
 0x205   : > { %1568 = vpow2.f32 %v999_v23  ;;  %v997_v14 = vmul.f32 1.442695, %v962_v56  ;;  %v1001_v21 = vmul.f32 1.442695, %v964_v9 }
 0x206   : > { %1570 = vpow2.f32 %v969_v62  ;;  %v1005_v27 = vmul.f32 1.442695, %v966_v13 }
 0x207   : > { %1572 = vpow2.f32 %v973_v63 }
 0x208   : > { %1574 = vpow2.f32 %v977_v0 }
 0x209   : > { %1576 = vpow2.f32 %v981_v59 }
 0x20a   : > { %v2169_v3 = vpop.eup %1552  ;;  %1578 = vpow2.f32 %v1003_v1 }
 0x20b   : > { %v2173_v6 = vpop.eup %1554  ;;  %v1007_v20 = vsel %vm908_vm4, %v2169_v3, 0.0  ;;  %1580 = vpow2.f32 %v985_v2 }
 0x20c   : > { %v2177_v7 = vpop.eup %1556  ;;  %v1008_v8 = vsel %vm908_vm4, %v2173_v6, 0.0  ;;  %1582 = vpow2.f32 %v989_v4 }
 0x20d   : > { %v2183_v11 = vpop.eup %1558  ;;  %v1009_v5 = vadd.f32 %v1008_v8, %v1007_v20  ;;  %v1010_v12 = vsel %vm908_vm4, %v2177_v7, 0.0  ;;  %1584 = vpow2.f32 %v993_v10 }
 0x20e   : > { %v2189_v15 = vpop.eup %1560  ;;  %v1012_v19 = vsel %vm908_vm4, %v2183_v11, 0.0  ;;  %1586 = vpow2.f32 %v997_v14 }
 0x20f   : > { %v1011_v16 = vadd.f32 %v1010_v12, %v1009_v5  ;;  %v2191_v17 = vpop.eup %1562  ;;  %v1014_v26 = vsel %vm908_vm4, %v2189_v15, 0.0  ;;  %1588 = vpow2.f32 %v1001_v21 }
 0x210   : > { %v1565_v22 = vpop.eup %1564  ;;  %v1016_v31 = vsel %vm908_vm4, %v2191_v17, 0.0  ;;  %1590 = vpow2.f32 %v1005_v27 }
 0x211   : > { %v1013_v24 = vadd.f32 %v1012_v19, %v1011_v16  ;;  %v1567_v25 = vpop.eup %1566  ;;  %v1018_v30 = vsel %vm908_vm4, %v1565_v22, 0.0 }
 0x212   : > { %v1569_v61 = vpop.eup %1568  ;;  %v1020_v48 = vsel %vm908_vm4, %v1567_v25, 0.0 }
 0x213   : > { %v1015_v28 = vadd.f32 %v1014_v26, %v1013_v24  ;;  %v2197_v29 = vpop.eup %1570  ;;  %v1022_v39 = vsel %vm908_vm4, %v1569_v61, 0.0 }
 0x214   : > { %v2201_v32 = vpop.eup %1572  ;;  %v1026_v37 = vsel %vm908_vm4, %v2197_v29, 0.0 }
 0x215   : > { %v1017_v33 = vadd.f32 %v1016_v31, %v1015_v28  ;;  %v2205_v40 = vpop.eup %1574  ;;  %v1027_v41 = vsel %vm908_vm4, %v2201_v32, 0.0 }
 0x216   : > { %v1577_v43 = vpop.eup %1576  ;;  %v1028_v45 = vadd.f32 %v1027_v41, %v1026_v37  ;;  %v1029_v50 = vsel %vm908_vm4, %v2205_v40, 0.0 }
 0x217   : > { %v1019_v18 = vadd.f32 %v1018_v30, %v1017_v33  ;;  %v1579_v47 = vpop.eup %1578  ;;  %v1031_v34 = vsel %vm908_vm4, %v1577_v43, 0.0 }
 0x218   : > { %v1581_v51 = vpop.eup %1580  ;;  %v1030_v54 = vadd.f32 %v1029_v50, %v1028_v45  ;;  %v1024_v36 = vsel %vm908_vm4, %v1579_v47, 0.0 }
 0x219   : > { %v1021_v53 = vadd.f32 %v1020_v48, %v1019_v18  ;;  %v1583_v46 = vpop.eup %1582  ;;  %v1033_v52 = vsel %vm908_vm4, %v1581_v51, 0.0 }
 0x21a   : > { %v1032_v38 = vadd.f32 %v1031_v34, %v1030_v54  ;;  %v1585_v55 = vpop.eup %1584  ;;  %v1035_v58 = vsel %vm908_vm4, %v1583_v46, 0.0 }
 0x21b   : > { %v1023_v35 = vadd.f32 %v1022_v39, %v1021_v53  ;;  %v1587_v60 = vpop.eup %1586  ;;  %v1037_v49 = vsel %vm908_vm4, %v1585_v55, 0.0 }
 0x21c   : > { %v1034_v23 = vadd.f32 %v1033_v52, %v1032_v38  ;;  %v1589_v63 = vpop.eup %1588  ;;  %v1039_v42 = vsel %vm908_vm4, %v1587_v60, 0.0 }
 0x21d   : > { %v1025_v57 = vadd.f32 %v1024_v36, %v1023_v35  ;;  %v1591_v59 = vpop.eup %1590  ;;  %v1041_v44 = vsel %vm908_vm4, %v1589_v63, 0.0 }
 0x21e   : > { %v1036_v62 = vadd.f32 %v1035_v58, %v1034_v23  ;;  %v1043_v56 = vsel %vm908_vm4, %v1591_v59, 0.0 }
 0x21f   : > { %1592 = vrcp.f32 %v1025_v57 }
 0x220   : > { %v1038_v0 = vadd.f32 %v1037_v49, %v1036_v62 }
 0x222   : > { %v1040_v1 = vadd.f32 %v1039_v42, %v1038_v0 }
 0x224   : > { %v1042_v2 = vadd.f32 %v1041_v44, %v1040_v1 }
 0x226   : > { %v1044_v4 = vadd.f32 %v1043_v56, %v1042_v2 }
 0x228   : > { %1594 = vrcp.f32 %v1044_v4 }
 0x22c   : > { %v1593_v20 = vpop.eup %1592 }
 0x22d   : > { %v1046_v8 = vmul.f32 %v1593_v20, %v2169_v3  ;;  %v1049_v9 = vmul.f32 %v1593_v20, %v2173_v6  ;;  %v1051_v10 = vmul.f32 %v1593_v20, %v2177_v7  ;;  %v1053_v5 = vmul.f32 %v1593_v20, %v2183_v11 }
 0x22e   : > { %v1055_v12 = vmul.f32 %v1593_v20, %v2189_v15  ;;  %v1057_v13 = vmul.f32 %v1593_v20, %v2191_v17  ;;  %v1059_v14 = vmul.f32 %v1593_v20, %v1565_v22  ;;  %v1061_v16 = vmul.f32 %v1593_v20, %v1567_v25 }
 0x22f   : > { %v1063_v19 = vmul.f32 %v1593_v20, %v1569_v61  ;;  %v1065_v21 = vmul.f32 %v1593_v20, %v1579_v47  ;;  %1067 = vst.msk [vmem:[%s2229_s17] sm:$0xff] %vm908_vm4, %v1046_v8  ;;  %1069 = vst.msk [vmem:[%s2229_s17 + $0x10] sm:$0xff] %vm908_vm4, %v1049_v9 }
 0x230   : > { %1071 = vst.msk [vmem:[%s2229_s17 + $0x20] sm:$0xff] %vm908_vm4, %v1051_v10  ;;  %1073 = vst.msk [vmem:[%s2229_s17 + $0x30] sm:$0xff] %vm908_vm4, %v1053_v5 }
 0x231   : > { %1075 = vst.msk [vmem:[%s2229_s17 + $0x40] sm:$0xff] %vm908_vm4, %v1055_v12  ;;  %1077 = vst.msk [vmem:[%s2229_s17 + $0x50] sm:$0xff] %vm908_vm4, %v1057_v13 }
 0x232   : > { %1079 = vst.msk [vmem:[%s2229_s17 + $0x60] sm:$0xff] %vm908_vm4, %v1059_v14  ;;  %1081 = vst.msk [vmem:[%s2229_s17 + $0x70] sm:$0xff] %vm908_vm4, %v1061_v16 }
 0x233   : > { %1083 = vst.msk [vmem:[%s2229_s17 + $0x80] sm:$0xff] %vm908_vm4, %v1063_v19  ;;  %1085 = vst.msk [vmem:[%s2229_s17 + $0x90] sm:$0xff] %vm908_vm4, %v1065_v21 }
 0x235   : > { %v1595_v3 = vpop.eup %1594 }
 0x236   : > { %v1048_v6 = vmul.f32 %v1595_v3, %v2197_v29  ;;  %v1050_v7 = vmul.f32 %v1595_v3, %v2201_v32  ;;  %v1052_v11 = vmul.f32 %v1595_v3, %v2205_v40  ;;  %v1054_v15 = vmul.f32 %v1595_v3, %v1577_v43  ;;  %v1163_v61 = vld [vmem:[%s2229_s17] sm:$0xff] (%p2354_p13)  ;;  %v1167_v29 = vld [vmem:[%s2229_s17 + $0x10] sm:$0xff] (%p2354_p13) }
 0x237   : > { %v1056_v17 = vmul.f32 %v1595_v3, %v1581_v51  ;;  %v1058_v22 = vmul.f32 %v1595_v3, %v1583_v46  ;;  %v1060_v24 = vmul.f32 %v1595_v3, %v1585_v55  ;;  %v1062_v25 = vmul.f32 %v1595_v3, %v1587_v60  ;;  %v1171_v32 = vld [vmem:[%s2229_s17 + $0x20] sm:$0xff] (%p2354_p13)  ;;  %1164 = vst [vmem:[%s2283_s27] sm:$0xff] (%p2354_p13), %v1163_v61  ;;  %v1175_v37 = vld [vmem:[%s2229_s17 + $0x30] sm:$0xff] (%p2354_p13) }
 0x238   : > { %v1064_v26 = vmul.f32 %v1595_v3, %v1589_v63  ;;  %v1066_v27 = vmul.f32 %v1595_v3, %v1591_v59  ;;  %1068 = vst.msk [vmem:[%s2229_s17 + $0x8] sm:$0xff] %vm908_vm4, %v1048_v6  ;;  %1070 = vst.msk [vmem:[%s2229_s17 + $0x18] sm:$0xff] %vm908_vm4, %v1050_v7  ;;  %1093 = sbr.rel (!%p2354_p13) target bundleno = 583 (0x247), region = 64  ;;  %v1179_v30 = vld [vmem:[%s2229_s17 + $0x40] sm:$0xff] (%p2354_p13)  ;;  %v1183_v43 = vld [vmem:[%s2229_s17 + $0x50] sm:$0xff] (%p2354_p13) }
 0x239   : > { %1072 = vst.msk [vmem:[%s2229_s17 + $0x28] sm:$0xff] %vm908_vm4, %v1052_v11  ;;  %1074 = vst.msk [vmem:[%s2229_s17 + $0x38] sm:$0xff] %vm908_vm4, %v1054_v15  ;;  %v1187_v45 = vld [vmem:[%s2229_s17 + $0x60] sm:$0xff] (%p2354_p13)  ;;  %v1191_v48 = vld [vmem:[%s2229_s17 + $0x70] sm:$0xff] (%p2354_p13) }
 0x23a   : > { %1076 = vst.msk [vmem:[%s2229_s17 + $0x48] sm:$0xff] %vm908_vm4, %v1056_v17  ;;  %1078 = vst.msk [vmem:[%s2229_s17 + $0x58] sm:$0xff] %vm908_vm4, %v1058_v22  ;;  %v1195_v51 = vld [vmem:[%s2229_s17 + $0x80] sm:$0xff] (%p2354_p13)  ;;  %v1199_v54 = vld [vmem:[%s2229_s17 + $0x90] sm:$0xff] (%p2354_p13) }
 0x23b   : > { %1080 = vst.msk [vmem:[%s2229_s17 + $0x68] sm:$0xff] %vm908_vm4, %v1060_v24  ;;  %1082 = vst.msk [vmem:[%s2229_s17 + $0x78] sm:$0xff] %vm908_vm4, %v1062_v25 }
 0x23c   : > { %1084 = vst.msk [vmem:[%s2229_s17 + $0x88] sm:$0xff] %vm908_vm4, %v1064_v26  ;;  %1086 = vst.msk [vmem:[%s2229_s17 + $0x98] sm:$0xff] %vm908_vm4, %v1066_v27 }
 0x23d   : > { %1168 = vst [vmem:[%s2283_s27 + $0x20] sm:$0xff] %v1167_v29  ;;  %1172 = vst [vmem:[%s2283_s27 + $0x40] sm:$0xff] %v1171_v32 }
 0x23e   : > { %1176 = vst [vmem:[%s2283_s27 + $0x60] sm:$0xff] %v1175_v37  ;;  %1180 = vst [vmem:[%s2283_s27 + $0x80] sm:$0xff] %v1179_v30 }
 0x23f   : > { %v1165_v28 = vld [vmem:[%s2229_s17 + $0x8] sm:$0xff]  ;;  %v1169_v31 = vld [vmem:[%s2229_s17 + $0x18] sm:$0xff]  ;;  %1184 = vst [vmem:[%s2283_s27 + $0xa0] sm:$0xff] %v1183_v43  ;;  %1188 = vst [vmem:[%s2283_s27 + $0xc0] sm:$0xff] %v1187_v45 }
 0x240   : > { %v1173_v33 = vld [vmem:[%s2229_s17 + $0x28] sm:$0xff]  ;;  %1166 = vst [vmem:[%s2283_s27 + $0x8] sm:$0xff] %v1165_v28  ;;  %1170 = vst [vmem:[%s2283_s27 + $0x28] sm:$0xff] %v1169_v31  ;;  %v1177_v40 = vld [vmem:[%s2229_s17 + $0x38] sm:$0xff] }
 0x241   : > { %1174 = vst [vmem:[%s2283_s27 + $0x48] sm:$0xff] %v1173_v33  ;;  %1178 = vst [vmem:[%s2283_s27 + $0x68] sm:$0xff] %v1177_v40  ;;  %v1181_v41 = vld [vmem:[%s2229_s17 + $0x48] sm:$0xff]  ;;  %v1185_v18 = vld [vmem:[%s2229_s17 + $0x58] sm:$0xff] }
 0x242   : > { %1182 = vst [vmem:[%s2283_s27 + $0x88] sm:$0xff] %v1181_v41  ;;  %1186 = vst [vmem:[%s2283_s27 + $0xa8] sm:$0xff] %v1185_v18  ;;  %v1189_v47 = vld [vmem:[%s2229_s17 + $0x68] sm:$0xff]  ;;  %v1193_v50 = vld [vmem:[%s2229_s17 + $0x78] sm:$0xff] }
 0x243   : > { %1190 = vst [vmem:[%s2283_s27 + $0xc8] sm:$0xff] %v1189_v47  ;;  %1192 = vst [vmem:[%s2283_s27 + $0xe0] sm:$0xff] %v1191_v48  ;;  %v1197_v53 = vld [vmem:[%s2229_s17 + $0x88] sm:$0xff]  ;;  %v1201_v39 = vld [vmem:[%s2229_s17 + $0x98] sm:$0xff] }
 0x244   : > { %1194 = vst [vmem:[%s2283_s27 + $0xe8] sm:$0xff] %v1193_v50  ;;  %1196 = vst [vmem:[%s2283_s27 + $0x100] sm:$0xff] %v1195_v51 }
 0x245   : > { %1198 = vst [vmem:[%s2283_s27 + $0x108] sm:$0xff] %v1197_v53  ;;  %1200 = vst [vmem:[%s2283_s27 + $0x120] sm:$0xff] %v1199_v54 }
 0x246   : > { %1202 = vst [vmem:[%s2283_s27 + $0x128] sm:$0xff] %v1201_v39 }
 0x247 PF: > { %p20_p0 = scmp.ge.s32.totalorder %s1768_s29, 4   ;;  %s2355_s24 = smov %s1682_s25 }
 0x248   : > { %s2356_s25 = smov %s1686_s26  ;;  %s2357_s26 = smov %s1778_s9 }
 0x249   : > { %s2358_s27 = smov %s1768_s29  ;;  %22 = sbr.rel (!%p20_p0) target bundleno = 7 (0x7), region = 151 }
 0x24e   :  { %1218 = vsyncpa [#allocation3], 1 }
 0x24f   :  { %1220 = vsyncpa [#allocation3 + $0x1], 1 }
 0x250   :  { %1221 = vsyncpa [#allocation5], 1 }
 0x251   :  { %1223 = vsyncpa [#allocation5 + $0x1], 1 }

</bundles_post_ra>
